<compile_context>
chip_gen: v5e
topology: v5e:2x2
jax: 0.10.0
libtpu: 0.0.40
codegen_flags: <defaults>
</compile_context>

<pallas_src>
import jax
import jax.numpy as jnp
from jax.experimental import pallas as pl
from jax.experimental.pallas import tpu as pltpu


def _softmax_lastdim_kernel(x_ref, o_ref):
    # Whole (B, R, C) tensor lives in a single VMEM block; the softmax axis
    # (dim=2) is the lane axis, so all reductions are lane reductions.
    x = x_ref[...].astype(jnp.float32)
    m = jnp.max(x, axis=-1, keepdims=True)        # numerically stable
    e = jnp.exp(x - m)                            # EUP
    s = jnp.sum(e, axis=-1, keepdims=True)        # XLU lane reduce
    o_ref[...] = (e / s).astype(o_ref.dtype)      # exact divide (no approx error)


def softmax_dim2(x3: jax.Array) -> jax.Array:
    """softmax over axis=2 of a rank-3 array, computed in one Pallas kernel.

    Handles any (B, R, C) in a single grid-less call; callers with many tiny
    softmaxes should stack them into one array and call this once.
    """
    assert x3.ndim == 3, "expected a rank-3 input (softmax over dim=2)"
    return pl.pallas_call(
        _softmax_lastdim_kernel,
        out_shape=jax.ShapeDtypeStruct(x3.shape, x3.dtype),
        # grid-less single-block call: no pipeline scaffolding, no double buffers
        in_specs=[pl.BlockSpec(memory_space=pltpu.MemorySpace.VMEM)],
        out_specs=pl.BlockSpec(memory_space=pltpu.MemorySpace.VMEM),
        # lets the writeback reuse the input buffer when the caller donates it
        input_output_aliases={0: 0},
    )(x3)


if __name__ == "__main__":
    key = jax.random.PRNGKey(0)
    # mirrors: x3 = torch.rand(1, 2, 2, dtype=torch.float64)  (f32 on TPU)
    x3 = jax.random.uniform(key, (1, 2, 2), dtype=jnp.float32)

    # reference computed before the kernel call (robust even under donation)
    ref = jax.nn.softmax(x3, axis=2)

    out = softmax_dim2(x3)
    out = jax.block_until_ready(out)

    assert out.shape == (1, 2, 2)
    assert jnp.allclose(out, ref, atol=1e-6, rtol=1e-6), (out, ref)
    # rows of a softmax must sum to 1
    assert jnp.allclose(jnp.sum(out, axis=2), 1.0, atol=1e-6), out

    print("KERNEL_OK")
</pallas_src>

<mosaic_0001>
module attributes {stable_mosaic.version = 11 : i64} {
  func.func @_softmax_lastdim_kernel(%arg0: memref<1x2x2xf32, #tpu.memory_space<vmem>>, %arg1: memref<1x2x2xf32, #tpu.memory_space<vmem>>) attributes {dimension_semantics = [], scalar_prefetch = 0 : i64, scratch_operands = 0 : i64, tpu.core_type = #tpu.core_type<tc>} {
    %c0 = arith.constant 0 : index
    %c0_0 = arith.constant 0 : index
    %c0_1 = arith.constant 0 : index
    %0 = vector.load %arg0[%c0, %c0_0, %c0_1] : memref<1x2x2xf32, #tpu.memory_space<vmem>>, vector<1x2x2xf32>
    %cst = arith.constant dense<0xFF800000> : vector<1x2xf32>
    %1 = vector.multi_reduction <maximumf>, %0, %cst [2] : vector<1x2x2xf32> to vector<1x2xf32>
    %2 = vector.shape_cast %1 : vector<1x2xf32> to vector<1x2x1xf32>
    %3 = vector.broadcast %2 : vector<1x2x1xf32> to vector<1x2x2xf32>
    %4 = arith.subf %0, %3 : vector<1x2x2xf32>
    %5 = math.exp %4 : vector<1x2x2xf32>
    %cst_2 = arith.constant dense<0.000000e+00> : vector<1x2xf32>
    %6 = vector.multi_reduction <add>, %5, %cst_2 [2] : vector<1x2x2xf32> to vector<1x2xf32>
    %7 = vector.shape_cast %6 : vector<1x2xf32> to vector<1x2x1xf32>
    %8 = vector.broadcast %7 : vector<1x2x1xf32> to vector<1x2x2xf32>
    %9 = arith.divf %5, %8 : vector<1x2x2xf32>
    %c0_3 = arith.constant 0 : index
    %c0_4 = arith.constant 0 : index
    %c0_5 = arith.constant 0 : index
    %10 = vector.load %arg1[%c0_3, %c0_4, %c0_5] : memref<1x2x2xf32, #tpu.memory_space<vmem>>, vector<1x2x2xf32>
    tpu.vector_store %arg1[%c0_3, %c0_4, %c0_5], %9 {strides = array<i32>} : memref<1x2x2xf32, #tpu.memory_space<vmem>>, vector<1x2x2xf32>,
    return
  }
}

</mosaic_0001>

<bundles_post_ra>
// kernel: tpu_custom_call.1
= control target key start
LH: loop header
LB: loop body
LE: loop exit
PB: predicated region body
PF: predicated region fallthrough
CT: control target
= control target key end

     0   :  { %6 = vsyncpa [#allocation3], 0  ;;  %s146_s0 = inlined_call_operand.hbm [shape: f32[1,2,2], index: 0, kind: input, shape index: {}, may-alias: {0,1}]   ;;  %s147_s1 = inlined_call_operand.hbm [shape: f32[1,2,2], index: 1, kind: output, shape index: {}, may-alias: {0,1}]  }
   0x1   :  { %7 = vsyncpa [#allocation4], 0  ;;  %s13_s8 = sshll.u32 %s146_s0, 4  ;;  %s125_s9 = smov [#allocation2]   ;;  %s14_s8 = int_to_ptr.hbm [resolvable:$true] %s13_s8 }
   0x2   :  { %s15_s10 = sshll.u32 %s125_s9, 4  ;;  %s16_s10 = int_to_ptr.vmem [resolvable:$true] %s15_s10 }
   0x3   :  { %18 = dma.hbm_to_vmem [thread:$0]  %s14_s8, 32, %s16_s10, [#allocation3]  }
   0x4   :  { %121 = dma.done.wait [#allocation3], 32  }
   0x5   :  { %122 = vsyncadd [#allocation3], 4294967264  ;;  %vm24_vm0 = vcmask 9216   ;;  %v23_v0 = vld [vmem:[#allocation2] sm:$0x3]  ;;  %s126_s0 = smov [#allocation5]  }
   0x6   :  { %v25_v1 = vsel %vm24_vm0, %v23_v0, -inf  ;;  %s55_s11 = sshll.u32 %s126_s0, 4  ;;  %s57_s14 = sshll.u32 %s147_s1, 4  ;;  %s56_s11 = int_to_ptr.vmem [resolvable:$true] %s55_s11  ;;  %s58_s14 = int_to_ptr.hbm [resolvable:$true] %s57_s14 }
   0x7   :  { %26 = vmax.xlane.f32.xlu0 %v25_v1 }
  0x7a   :  { %v27_v2 = vpop.xlane.xlu0 %26 }
  0x7b   :  { %v28_v3 = vsub.f32 %v23_v0, %v27_v2 }
  0x7d   :  { %v29_v4 = vmul.f32 1.442695, %v28_v3 }
  0x7f   :  { %69 = vpow2.f32 %v29_v4 }
  0x85   :  { %v70_v5 = vpop.eup %69 }
  0x86   :  { %v31_v6 = vsel %vm24_vm0, %v70_v5, 0.0 }
  0x87   :  { %32 = vadd.xlane.f32.xlu0 %v31_v6 }
  0xfa   :  { %v33_v7 = vpop.xlane.xlu0 %32 }
  0xfb   :  { %71 = vrcp.f32 %v33_v7  ;;  %v45_v11 = vand.u32 2147483648, %v33_v7  ;;  %v43_v13 = vand.u32 2147483647, %v33_v7  ;;  %vm39_vm2 = vweird.f32 %v33_v7 }
  0xfd   :  { %v46_v15 = vor.u32 1.1754944e-38, %v45_v11  ;;  %vm44_vm4 = vcmp.eq.f32.partialorder %v43_v13, 8.507059e+37 }
 0x101   :  { %v72_v8 = vpop.eup %71 }
 0x102   :  { %v35_v9 = vmul.f32 %v72_v8, %v33_v7  ;;  %vm40_vm1 = vweird.f32 %v72_v8 }
 0x103   :  { %vm41_vm3 = vmor %vm39_vm2, %vm40_vm1 }
 0x104   :  { %v36_v10 = vsub.f32 1.0, %v35_v9 }
 0x106   :  { %v37_v12 = vmul.f32 %v72_v8, %v36_v10 }
 0x108   :  { %v38_v14 = vadd.f32 %v72_v8, %v37_v12 }
 0x10a   :  { %v42_v16 = vsel %vm41_vm3, %v72_v8, %v38_v14 }
 0x10b   :  { %v47_v17 = vsel %vm44_vm4, %v46_v15, %v42_v16 }
 0x10c   :  { %v48_v18 = vmul.f32 %v70_v5, %v47_v17 }
 0x10e   :  { %49 = vst.msk [vmem:[#allocation5] sm:$0x3] %vm24_vm0, %v48_v18 }
 0x10f   :  { %60 = dma.vmem_to_hbm [thread:$0]  %s56_s11, 32, %s58_s14, [#allocation4]  }
 0x110   :  { %123 = dma.done.wait [#allocation4], 32  }
 0x111   :  { %124 = vsyncadd [#allocation4], 4294967264 }
 0x112   :  { %65 = vsyncpa [#allocation3], 1 }
 0x113   :  { %66 = vsyncpa [#allocation4], 1 }

</bundles_post_ra>
